<compile_context>
chip_gen: v5e
topology: v5e:2x2
jax: 0.10.0
libtpu: 0.0.40
codegen_flags: <defaults>
</compile_context>

<pallas_src>
import numpy as np
import jax
import jax.numpy as jnp
from jax.experimental import pallas as pl
from jax.experimental.pallas import tpu as pltpu

EMBED = 32        # embedSize (small, per instructions; module default is 100)
NUM_CLASSES = 5   # numClasses
VOCAB = 20        # vocabSize


def _round_up(x, m):
    return (x + m - 1) // m * m


# ---------------------------------------------------------------------------
# Kernel: one grid step per tree level
# ---------------------------------------------------------------------------
def recursive_nn_kernel(off_ref,      # SMEM [D] int32: row offset of each level (mult. of 8)
                        leaf_ref,     # [N_pad, E_pad] f32: pre-gathered leaf embeddings (0 elsewhere)
                        sel_ref,      # [1, 2*LW, N_pad] bf16: this level's L/R child selectors
                        wt_ref,       # [2*E_pad, E_pad] f32: W.weight^T (zero padded)
                        bw_ref,       # [1, E_pad] f32
                        pt_ref,       # [E_pad, C_pad] f32: projection.weight^T (zero padded)
                        bp_ref,       # [1, C_pad] f32
                        out_ref,      # [N_pad, C_pad] f32
                        h_ref):       # VMEM scratch [N_pad, E_pad] f32: node hidden states
    l = pl.program_id(0)
    e_pad = h_ref.shape[1]
    lw = sel_ref.shape[1] // 2

    # ---- leaf pass (once): relu of the pre-gathered leaf table; internal rows are 0 ----
    @pl.when(l == 0)
    def _():
        h_ref[...] = jnp.maximum(leaf_ref[...], 0.0)

    # ---- gather both children of every node in this level with ONE matmul ----
    sel = sel_ref[0].astype(jnp.float32)                                  # 0/1, exact
    res = jnp.dot(sel, h_ref[...], preferred_element_type=jnp.float32)    # [2LW, E_pad]
    hl = res[:lw, :]                                                      # sublane slices
    hr = res[lw:, :]

    # relu([hl, hr] @ W^T + bW) as two half matmuls (no lane concat needed)
    z = jnp.maximum(
        jnp.dot(hl, wt_ref[0:e_pad, :], preferred_element_type=jnp.float32)
        + jnp.dot(hr, wt_ref[e_pad:2 * e_pad, :], preferred_element_type=jnp.float32)
        + bw_ref[...],
        0.0)                                                              # [LW, E_pad]

    # ---- contiguous, sublane-aligned store of this level's rows ----
    off = pl.multiple_of(off_ref[l], 8)
    h_ref[pl.ds(off, lw), :] = z

    # ---- after the last level: batched class projection for every node ----
    @pl.when(l == pl.num_programs(0) - 1)
    def _():
        out_ref[...] = (jnp.dot(h_ref[...], pt_ref[...],
                                preferred_element_type=jnp.float32)
                        + bp_ref[...])


# ---------------------------------------------------------------------------
# Host-side tree-structure plumbing (schedule construction, no NN math)
# ---------------------------------------------------------------------------
def build_schedule(is_leaf, a_idx, b_idx):
    is_leaf = np.asarray(is_leaf)
    a_idx = np.asarray(a_idx)
    b_idx = np.asarray(b_idx)
    n = is_leaf.shape[0]

    depth = np.zeros(n, np.int32)
    for i in range(n):
        if is_leaf[i]:
            depth[i] = 0
        else:
            assert a_idx[i] < i and b_idx[i] < i, "node list must be post-order"
            depth[i] = max(depth[a_idx[i]], depth[b_idx[i]]) + 1

    max_d = int(depth.max())
    assert max_d >= 1, "need at least one internal node"
    levels = [[i for i in range(n) if (not is_leaf[i]) and depth[i] == d + 1]
              for d in range(max_d)]
    leaves = [i for i in range(n) if is_leaf[i]]

    lw_pad = _round_up(max(len(lv) for lv in levels), 8)
    leaf_block = _round_up(max(len(leaves), 1), 8)
    level_off = np.array([leaf_block + d * lw_pad for d in range(max_d)], np.int32)
    n_pad = int(level_off[-1] + lw_pad)

    # row of each original node in the level-ordered table
    pos = np.zeros(n, np.int32)
    for r, i in enumerate(leaves):
        pos[i] = r
    for d, lv in enumerate(levels):
        for j, i in enumerate(lv):
            pos[i] = level_off[d] + j

    # per-level fused child selectors: rows [0,LW) gather left child, [LW,2LW) right
    sel = np.zeros((max_d, 2 * lw_pad, n_pad), np.float32)
    for d, lv in enumerate(levels):
        for j, i in enumerate(lv):
            sel[d, j, pos[a_idx[i]]] = 1.0
            sel[d, lw_pad + j, pos[b_idx[i]]] = 1.0

    # leaf word id + mask per (permuted) row, for the out-of-kernel embedding gather
    words = np.zeros(n_pad, np.int32)
    leaf_mask = np.zeros(n_pad, np.float32)
    for i in leaves:
        words[pos[i]] = int(a_idx[i])
        leaf_mask[pos[i]] = 1.0

    return sel, level_off, words, leaf_mask, pos, n_pad, lw_pad


# ---------------------------------------------------------------------------
# Wrapper
# ---------------------------------------------------------------------------
def recursive_nn_forward(is_leaf, a_idx, b_idx, emb, W, bW, P, bP):
    n = int(np.asarray(is_leaf).shape[0])
    V, E = int(emb.shape[0]), int(emb.shape[1])
    C = int(P.shape[0])
    e_pad = _round_up(max(E, 128), 128)    # lane-dense hidden dim
    c_pad = _round_up(max(C, 128), 128)    # lane-dense logits

    sel, level_off, words, leaf_mask, pos, n_pad, lw_pad = build_schedule(
        is_leaf, a_idx, b_idx)
    D = sel.shape[0]

    # Leaf embedding gather OUTSIDE the kernel (no one-hot vocab matmul).
    emb_f32 = jnp.asarray(emb, jnp.float32)
    leaf_tab = jnp.take(emb_f32, jnp.asarray(words), axis=0) \
        * jnp.asarray(leaf_mask)[:, None]                                 # [n_pad, E]
    leaf_tab = jnp.pad(leaf_tab, ((0, 0), (0, e_pad - E)))                # [n_pad, e_pad]

    # Zero-padded, lane-dense weights.
    Wt = np.asarray(W, np.float32).T                                      # [2E, E]
    wt = np.zeros((2 * e_pad, e_pad), np.float32)
    wt[:E, :E] = Wt[:E]                    # left-child half of W^T
    wt[e_pad:e_pad + E, :E] = Wt[E:]       # right-child half of W^T
    bw = np.zeros((1, e_pad), np.float32); bw[0, :E] = np.asarray(bW, np.float32)
    pt = np.zeros((e_pad, c_pad), np.float32); pt[:E, :C] = np.asarray(P, np.float32).T
    bp = np.zeros((1, c_pad), np.float32); bp[0, :C] = np.asarray(bP, np.float32)

    sel_bf16 = jnp.asarray(sel, jnp.bfloat16)   # 0/1 selectors: exact in bf16, half the bytes

    args = (jnp.asarray(level_off, jnp.int32),  # scalar prefetch (SMEM)
            leaf_tab, sel_bf16,
            jnp.asarray(wt), jnp.asarray(bw), jnp.asarray(pt), jnp.asarray(bp))

    grid_spec = pltpu.PrefetchScalarGridSpec(
        num_scalar_prefetch=1,
        grid=(D,),
        in_specs=[
            pl.BlockSpec((n_pad, e_pad), lambda l, off: (0, 0)),              # leaf table (resident)
            pl.BlockSpec((1, 2 * lw_pad, n_pad), lambda l, off: (l, 0, 0)),   # stream one level slab
            pl.BlockSpec((2 * e_pad, e_pad), lambda l, off: (0, 0)),          # W^T (resident)
            pl.BlockSpec((1, e_pad), lambda l, off: (0, 0)),
            pl.BlockSpec((e_pad, c_pad), lambda l, off: (0, 0)),
            pl.BlockSpec((1, c_pad), lambda l, off: (0, 0)),
        ],
        out_specs=pl.BlockSpec((n_pad, c_pad), lambda l, off: (0, 0)),
        scratch_shapes=[pltpu.VMEM((n_pad, e_pad), jnp.float32)],
    )

    flops = 2 * (D * (2 * lw_pad * n_pad * e_pad + 2 * lw_pad * e_pad * e_pad)
                 + n_pad * e_pad * c_pad)
    bytes_accessed = int(leaf_tab.size * 4 + sel.size * 2 + wt.size * 4 + bw.size * 4
                         + pt.size * 4 + bp.size * 4 + n_pad * c_pad * 4)

    out_pad = pl.pallas_call(
        recursive_nn_kernel,
        out_shape=jax.ShapeDtypeStruct((n_pad, c_pad), jnp.float32),
        grid_spec=grid_spec,
        compiler_params=pltpu.CompilerParams(dimension_semantics=("arbitrary",)),
        cost_estimate=pl.CostEstimate(flops=int(flops), transcendentals=0,
                                      bytes_accessed=bytes_accessed),
    )(*args)

    # Un-permute (level order -> original post-order) and drop padding.
    return out_pad[jnp.asarray(pos), :C]


# ---------------------------------------------------------------------------
# Pure-JAX reference (replica of RecursiveNN.forward on a post-order node list)
# ---------------------------------------------------------------------------
def reference_forward(is_leaf, a_idx, b_idx, emb, W, bW, P, bP):
    n = int(np.asarray(is_leaf).shape[0])
    h, probs = [], []
    for i in range(n):
        if int(is_leaf[i]) == 1:
            hi = jnp.maximum(emb[int(a_idx[i])], 0.0)
        else:
            cat = jnp.concatenate([h[int(a_idx[i])], h[int(b_idx[i])]])
            hi = jnp.maximum(W @ cat + bW, 0.0)
        h.append(hi)
        probs.append(P @ hi + bP)
    return jnp.stack(probs)


if __name__ == "__main__":
    key = jax.random.PRNGKey(0)
    k1, k2, k3, k4, k5 = jax.random.split(key, 5)

    # Deterministic parameter init (shapes from RecursiveNN.__init__).
    emb = jax.random.normal(k1, (VOCAB, EMBED), jnp.float32) * 0.5
    W = jax.random.normal(k2, (EMBED, 2 * EMBED), jnp.float32) * 0.1    # Linear(2E, E).weight
    bW = jax.random.normal(k3, (EMBED,), jnp.float32) * 0.1
    P = jax.random.normal(k4, (NUM_CLASSES, EMBED), jnp.float32) * 0.1  # Linear(E, C).weight
    bP = jax.random.normal(k5, (NUM_CLASSES,), jnp.float32) * 0.1

    # Two small binary trees, post-order, packed into one node list (cross-tree batching).
    tree1 = dict(is_leaf=[1, 1, 0, 1, 1, 0, 0],
                 a=[3, 7, 0, 1, 12, 3, 2],
                 b=[0, 0, 1, 0, 0, 4, 5])
    tree2 = dict(is_leaf=[1, 1, 0, 1, 0],
                 a=[2, 9, 0, 5, 2],
                 b=[0, 0, 1, 0, 3])

    is_leaf, a_idx, b_idx = [], [], []
    for tree in (tree1, tree2):
        off = len(is_leaf)
        for lf, a, b in zip(tree["is_leaf"], tree["a"], tree["b"]):
            is_leaf.append(lf)
            a_idx.append(a if lf else a + off)   # word id for leaves, child index otherwise
            b_idx.append(b if lf else b + off)
    is_leaf = np.asarray(is_leaf, np.int32)
    a_idx = np.asarray(a_idx, np.int32)
    b_idx = np.asarray(b_idx, np.int32)

    out = recursive_nn_forward(is_leaf, a_idx, b_idx, emb, W, bW, P, bP)
    out = jax.block_until_ready(out)

    ref = reference_forward(is_leaf, a_idx, b_idx, emb, W, bW, P, bP)
    assert out.shape == (int(is_leaf.shape[0]), NUM_CLASSES), out.shape
    assert jnp.allclose(out, ref, atol=1e-4, rtol=1e-4), (out, ref)

    print("KERNEL_OK")
</pallas_src>

<mosaic_0001>
module attributes {stable_mosaic.version = 11 : i64} {
  func.func @recursive_nn_kernel(%arg0: i32, %arg1: memref<2xi32, #tpu.memory_space<smem>>, %arg2: memref<24x128xf32, #tpu.memory_space<vmem>>, %arg3: memref<1x16x24xbf16, #tpu.memory_space<vmem>>, %arg4: memref<256x128xf32, #tpu.memory_space<vmem>>, %arg5: memref<1x128xf32, #tpu.memory_space<vmem>>, %arg6: memref<128x128xf32, #tpu.memory_space<vmem>>, %arg7: memref<1x128xf32, #tpu.memory_space<vmem>>, %arg8: memref<24x128xf32, #tpu.memory_space<vmem>>, %arg9: memref<24x128xf32, #tpu.memory_space<vmem>>) attributes {dimension_semantics = [#tpu.dimension_semantics<arbitrary>], iteration_bounds = array<i64: 2>, scalar_prefetch = 1 : i64, scratch_operands = 1 : i64, tpu.core_type = #tpu.core_type<tc>, window_params = [{pipeline_mode = #tpu.pipeline_mode<synchronous>, transform_indices = @transform_0, window_bounds = array<i64: 24, 128>}, {transform_indices = @transform_1, window_bounds = array<i64: 1, 16, 24>}, {pipeline_mode = #tpu.pipeline_mode<synchronous>, transform_indices = @transform_2, window_bounds = array<i64: 256, 128>}, {pipeline_mode = #tpu.pipeline_mode<synchronous>, transform_indices = @transform_3, window_bounds = array<i64: 1, 128>}, {pipeline_mode = #tpu.pipeline_mode<synchronous>, transform_indices = @transform_4, window_bounds = array<i64: 128, 128>}, {pipeline_mode = #tpu.pipeline_mode<synchronous>, transform_indices = @transform_5, window_bounds = array<i64: 1, 128>}, {pipeline_mode = #tpu.pipeline_mode<synchronous>, transform_indices = @transform_6, window_bounds = array<i64: 24, 128>}]} {
    %c0_i32 = arith.constant 0 : i32
    %0 = arith.cmpi eq, %arg0, %c0_i32 : i32
    %1 = arith.extui %0 : i1 to i32
    %c0_i32_0 = arith.constant 0 : i32
    %2 = arith.cmpi ne, %1, %c0_i32_0 : i32
    scf.if %2 {
      %c0_15 = arith.constant 0 : index
      %c0_16 = arith.constant 0 : index
      %28 = vector.load %arg2[%c0_15, %c0_16] : memref<24x128xf32, #tpu.memory_space<vmem>>, vector<24x128xf32>
      %cst_17 = arith.constant 0.000000e+00 : f32
      %29 = vector.broadcast %cst_17 : f32 to vector<24x128xf32>
      %30 = arith.maximumf %28, %29 : vector<24x128xf32>
      %c0_18 = arith.constant 0 : index
      %c0_19 = arith.constant 0 : index
      %31 = vector.load %arg9[%c0_18, %c0_19] : memref<24x128xf32, #tpu.memory_space<vmem>>, vector<24x128xf32>
      tpu.vector_store %arg9[%c0_18, %c0_19], %30 {strides = array<i32>} : memref<24x128xf32, #tpu.memory_space<vmem>>, vector<24x128xf32>,
    } else {
    }
    %c0 = arith.constant 0 : index
    %c0_1 = arith.constant 0 : index
    %c0_2 = arith.constant 0 : index
    %3 = vector.load %arg3[%c0, %c0_1, %c0_2] : memref<1x16x24xbf16, #tpu.memory_space<vmem>>, vector<1x16x24xbf16>
    %4 = vector.shape_cast %3 : vector<1x16x24xbf16> to vector<16x24xbf16>
    %5 = arith.extf %4 : vector<16x24xbf16> to vector<16x24xf32>
    %c0_3 = arith.constant 0 : index
    %c0_4 = arith.constant 0 : index
    %6 = vector.load %arg9[%c0_3, %c0_4] : memref<24x128xf32, #tpu.memory_space<vmem>>, vector<24x128xf32>
    %cst = arith.constant dense<0.000000e+00> : vector<16x128xf32>
    %7 = tpu.matmul %5, %6, %cst {dimension_numbers = #tpu.dot_dimension_numbers<[1], [0], [0], [1], [0, 0, 1, 1], [], []>} : vector<16x24xf32>, vector<24x128xf32>, vector<16x128xf32> -> vector<16x128xf32>
    %8 = vector.extract_strided_slice %7 {offsets = [0, 0], sizes = [8, 128], strides = [1, 1]} : vector<16x128xf32> to vector<8x128xf32>
    %9 = vector.extract_strided_slice %7 {offsets = [8, 0], sizes = [8, 128], strides = [1, 1]} : vector<16x128xf32> to vector<8x128xf32>
    %c0_5 = arith.constant 0 : index
    %c0_6 = arith.constant 0 : index
    %10 = vector.load %arg4[%c0_5, %c0_6] : memref<256x128xf32, #tpu.memory_space<vmem>>, vector<128x128xf32>
    %cst_7 = arith.constant dense<0.000000e+00> : vector<8x128xf32>
    %11 = tpu.matmul %8, %10, %cst_7 {dimension_numbers = #tpu.dot_dimension_numbers<[1], [0], [0], [1], [0, 0, 1, 1], [], []>} : vector<8x128xf32>, vector<128x128xf32>, vector<8x128xf32> -> vector<8x128xf32>
    %c128 = arith.constant 128 : index
    %c0_8 = arith.constant 0 : index
    %12 = vector.load %arg4[%c128, %c0_8] : memref<256x128xf32, #tpu.memory_space<vmem>>, vector<128x128xf32>
    %cst_9 = arith.constant dense<0.000000e+00> : vector<8x128xf32>
    %13 = tpu.matmul %9, %12, %cst_9 {dimension_numbers = #tpu.dot_dimension_numbers<[1], [0], [0], [1], [0, 0, 1, 1], [], []>} : vector<8x128xf32>, vector<128x128xf32>, vector<8x128xf32> -> vector<8x128xf32>
    %14 = arith.addf %11, %13 : vector<8x128xf32>
    %c0_10 = arith.constant 0 : index
    %c0_11 = arith.constant 0 : index
    %15 = vector.load %arg5[%c0_10, %c0_11] : memref<1x128xf32, #tpu.memory_space<vmem>>, vector<1x128xf32>
    %16 = vector.broadcast %15 : vector<1x128xf32> to vector<8x128xf32>
    %17 = arith.addf %14, %16 : vector<8x128xf32>
    %cst_12 = arith.constant 0.000000e+00 : f32
    %18 = vector.broadcast %cst_12 : f32 to vector<8x128xf32>
    %19 = arith.maximumf %17, %18 : vector<8x128xf32>
    %20 = arith.index_cast %arg0 : i32 to index
    %21 = memref.load %arg1[%20] : memref<2xi32, #tpu.memory_space<smem>>
    %22 = tpu.assume_multiple %21, 8 : i32
    %23 = arith.index_cast %22 : i32 to index
    %c0_13 = arith.constant 0 : index
    %24 = vector.load %arg9[%23, %c0_13] : memref<24x128xf32, #tpu.memory_space<vmem>>, vector<8x128xf32>
    tpu.vector_store %arg9[%23, %c0_13], %19 {strides = array<i32>} : memref<24x128xf32, #tpu.memory_space<vmem>>, vector<8x128xf32>,
    %c1_i32 = arith.constant 1 : i32
    %25 = arith.cmpi eq, %arg0, %c1_i32 : i32
    %26 = arith.extui %25 : i1 to i32
    %c0_i32_14 = arith.constant 0 : i32
    %27 = arith.cmpi ne, %26, %c0_i32_14 : i32
    scf.if %27 {
      %c0_15 = arith.constant 0 : index
      %c0_16 = arith.constant 0 : index
      %28 = vector.load %arg9[%c0_15, %c0_16] : memref<24x128xf32, #tpu.memory_space<vmem>>, vector<24x128xf32>
      %c0_17 = arith.constant 0 : index
      %c0_18 = arith.constant 0 : index
      %29 = vector.load %arg6[%c0_17, %c0_18] : memref<128x128xf32, #tpu.memory_space<vmem>>, vector<128x128xf32>
      %cst_19 = arith.constant dense<0.000000e+00> : vector<24x128xf32>
      %30 = tpu.matmul %28, %29, %cst_19 {dimension_numbers = #tpu.dot_dimension_numbers<[1], [0], [0], [1], [0, 0, 1, 1], [], []>} : vector<24x128xf32>, vector<128x128xf32>, vector<24x128xf32> -> vector<24x128xf32>
      %c0_20 = arith.constant 0 : index
      %c0_21 = arith.constant 0 : index
      %31 = vector.load %arg7[%c0_20, %c0_21] : memref<1x128xf32, #tpu.memory_space<vmem>>, vector<1x128xf32>
      %32 = vector.broadcast %31 : vector<1x128xf32> to vector<24x128xf32>
      %33 = arith.addf %30, %32 : vector<24x128xf32>
      %c0_22 = arith.constant 0 : index
      %c0_23 = arith.constant 0 : index
      %34 = vector.load %arg8[%c0_22, %c0_23] : memref<24x128xf32, #tpu.memory_space<vmem>>, vector<24x128xf32>
      tpu.vector_store %arg8[%c0_22, %c0_23], %33 {strides = array<i32>} : memref<24x128xf32, #tpu.memory_space<vmem>>, vector<24x128xf32>,
    } else {
    }
    return
  }
  func.func @transform_0(%arg0: i32, %arg1: memref<2xi32, #tpu.memory_space<smem>>) -> (i32, i32) {
    %c0_i32 = arith.constant 0 : i32
    %c0_i32_0 = arith.constant 0 : i32
    %c0_i32_1 = arith.constant 0 : i32
    return %c0_i32, %c0_i32_0 : i32, i32
  }
  func.func @transform_1(%arg0: i32, %arg1: memref<2xi32, #tpu.memory_space<smem>>) -> (i32, i32, i32) {
    %c0_i32 = arith.constant 0 : i32
    %c0_i32_0 = arith.constant 0 : i32
    %c0_i32_1 = arith.constant 0 : i32
    return %arg0, %c0_i32, %c0_i32_0 : i32, i32, i32
  }
  func.func @transform_2(%arg0: i32, %arg1: memref<2xi32, #tpu.memory_space<smem>>) -> (i32, i32) {
    %c0_i32 = arith.constant 0 : i32
    %c0_i32_0 = arith.constant 0 : i32
    %c0_i32_1 = arith.constant 0 : i32
    return %c0_i32, %c0_i32_0 : i32, i32
  }
  func.func @transform_3(%arg0: i32, %arg1: memref<2xi32, #tpu.memory_space<smem>>) -> (i32, i32) {
    %c0_i32 = arith.constant 0 : i32
    %c0_i32_0 = arith.constant 0 : i32
    %c0_i32_1 = arith.constant 0 : i32
    return %c0_i32, %c0_i32_0 : i32, i32
  }
  func.func @transform_4(%arg0: i32, %arg1: memref<2xi32, #tpu.memory_space<smem>>) -> (i32, i32) {
    %c0_i32 = arith.constant 0 : i32
    %c0_i32_0 = arith.constant 0 : i32
    %c0_i32_1 = arith.constant 0 : i32
    return %c0_i32, %c0_i32_0 : i32, i32
  }
  func.func @transform_5(%arg0: i32, %arg1: memref<2xi32, #tpu.memory_space<smem>>) -> (i32, i32) {
    %c0_i32 = arith.constant 0 : i32
    %c0_i32_0 = arith.constant 0 : i32
    %c0_i32_1 = arith.constant 0 : i32
    return %c0_i32, %c0_i32_0 : i32, i32
  }
  func.func @transform_6(%arg0: i32, %arg1: memref<2xi32, #tpu.memory_space<smem>>) -> (i32, i32) {
    %c0_i32 = arith.constant 0 : i32
    %c0_i32_0 = arith.constant 0 : i32
    %c0_i32_1 = arith.constant 0 : i32
    return %c0_i32, %c0_i32_0 : i32, i32
  }
}

</mosaic_0001>

<bundles_post_ra>
// kernel: tpu_custom_call.1
= control target key start
LH: loop header
LB: loop body
LE: loop exit
PB: predicated region body
PF: predicated region fallthrough
CT: control target
= control target key end

     0   :  { %s958_s27 = smov [#allocation4]   ;;  %s1155_s0 = inlined_call_operand.hbm [shape: s32[2], index: 0, kind: input, shape index: {}]   ;;  %s1156_s1 = inlined_call_operand.hbm [shape: f32[24,128], index: 1, kind: input, shape index: {}]   ;;  %s1157_s2 = inlined_call_operand.hbm [shape: bf16[2,16,24], index: 2, kind: input, shape index: {}]   ;;  %s1158_s3 = inlined_call_operand.hbm [shape: f32[256,128], index: 3, kind: input, shape index: {}]   ;;  %s1159_s4 = inlined_call_operand.vmem [shape: f32[1,128], index: 4, kind: input, shape index: {}]   ;;  %s1160_s5 = inlined_call_operand.hbm [shape: f32[128,128], index: 5, kind: input, shape index: {}]   ;;  %s1161_s6 = inlined_call_operand.vmem [shape: f32[1,128], index: 6, kind: input, shape index: {}]   ;;  %s1162_s7 = inlined_call_operand.hbm [shape: f32[24,128], index: 7, kind: output, shape index: {}]  }
   0x1   :  { %s13_s26 = sshll.u32 %s1155_s0, 4  ;;  %s14_s26 = int_to_ptr.hbm [resolvable:$true] %s13_s26 }
   0x2   :  { %16 = dma.hbm_to_smem %s14_s26, 16, %s958_s27, [#allocation3] }
   0x3   :  { %920 = dma.done.wait [#allocation3], 16 }
   0x4   :  { %921 = vsyncadd [#allocation3], 4294967280 }
   0x5   :  { %19 = sfence }
   0x6   :  { %20 = vsyncpa [#allocation6], 0 }
   0x7   :  { %21 = vsyncpa [#allocation9], 0 }
   0x8   :  { %23 = vsyncpa [#allocation9 + $0x1], 0 }
   0x9   :  { %24 = vsyncpa [#allocation12], 0 }
   0xa   :  { %25 = vsyncpa [#allocation7], 0  ;;  %s1012_s28 = smov 0   ;;  %s1014_s29 = smov 0  }
   0xb   :  { %s1016_s30 = smov 0   ;;  %s1018_s8 = smov 0  }
   0xc LB: > { %s1031_s0 = sadd.s32 4294967295, %s956_s8   ;;  %p72_p0 = scmp.ne.s32.totalorder %s948_s29, %s944_s28  ;;  %s956_s8 = sphi %s1018_s8, %s1170_s8   ;;  %s952_s30 = sphi %s1016_s30, %s1169_s30   ;;  %s948_s29 = sphi %s1014_s29, %s1168_s29   ;;  %s944_s28 = sphi %s1012_s28, %s1167_s28  }
   0xd   : > { %p73_p1 = scmp.eq.s32.totalorder %s1031_s0, 0  ;;  %p600_p2 = scmp.ge.s32.totalorder %s956_s8, 1 }
   0xe   : > { %p188_p3 = scmp.lt.s32.totalorder %s956_s8, 3  ;;  %p601_p4 = scmp.ne.s32.totalorder %s1031_s0, 0 }
   0xf   : > { %p1040_p5 = por %p73_p1, %p72_p0  ;;  %s213_s13 = sshll.u32 %s1158_s3, 4  ;;  %s214_s13 = int_to_ptr.hbm [resolvable:$true] %s213_s13 }
  0x10   : > { %p1044_p6 = pnand %p600_p2, %p188_p3  ;;  %s959_s14 = smov [#allocation10]  }
  0x11   : > { %s215_s15 = sshll.u32 %s959_s14, 4  ;;  %s199_s19 = sshll.u32 %s1156_s1, 4  ;;  %s216_s15 = int_to_ptr.vmem [resolvable:$true] %s215_s15  ;;  %s200_s19 = int_to_ptr.hbm [resolvable:$true] %s199_s19 }
  0x12   : > { %p676_p7 = pneg %p1044_p6  ;;  %s960_s20 = smov 128  }
  0x13   : > { %s961_s21 = smov 8   ;;  %s962_s22 = smov [#allocation5]  }
  0x14   : > { %p1055_p8 = pnand %p676_p7, %p73_p1  ;;  %s201_s23 = sshll.u32 %s962_s22, 4  ;;  %s202_s23 = int_to_ptr.vmem [resolvable:$true] %s201_s23 }
  0x15   : > { %s230_s26 = sshll.u32 %s1160_s5, 4  ;;  %s963_s27 = smov [#allocation11]   ;;  %s231_s26 = int_to_ptr.hbm [resolvable:$true] %s230_s26 }
  0x16   : > { %682 = dma.hbm_to_vmem [thread:$0]  (!%p1055_p8), %s214_s13, 4096, %s216_s15, [#allocation9], %s960_s20, %s960_s20, %s961_s21  }
  0x17   : > { %679 = dma.hbm_to_vmem [thread:$0]  (!%p1055_p8), %s200_s19, 384, %s202_s23, [#allocation6], %s960_s20, %s960_s20, %s961_s21  }
  0x18   : > { %s232_s28 = sshll.u32 %s963_s27, 4  ;;  %s1070_s11 = sadd.s32 1, %s956_s8   ;;  %s233_s28 = int_to_ptr.vmem [resolvable:$true] %s232_s28 }
  0x19   : > { %685 = dma.hbm_to_vmem [thread:$0]  (!%p1055_p8), %s231_s26, 2048, %s233_s28, [#allocation12], %s960_s20, %s960_s20, %s961_s21  }
  0x1a   : > { %s56_s12 = ssub.s32 %s956_s8, %s1070_s11  ;;  %s59_s13 = sadd.s32 1, %s952_s30 }
  0x1b   : > { %p57_p9 = scmp.eq.s32.totalorder %s56_s12, 0  ;;  %p66_p10 = scmp.ne.s32.totalorder %s952_s30, %s948_s29 }
  0x1c   : > { %p67_p11 = scmp.eq.s32.totalorder %s956_s8, 0  ;;  %p693_p12 = scmp.lt.s32.totalorder %s956_s8, 2 }
  0x1d   : > { %s1082_s14 = scalar_select %p57_p9, %s952_s30, %s59_s13  }
  0x1e   : > { %p68_p13 = por %p67_p11, %p66_p10  ;;  %s249_s15 = sand.u32 1, %s956_s8  }
  0x1f   : > { %s251_s17 = sand.u32 1, %s952_s30   ;;  %s621_s19 = sshll.u32 %s956_s8, 3 }
  0x20   : > { %s605_s18 = sshll.u32 %s251_s17, 3  ;;  %s258_s16 = scalar_lea.hbm %s1157_s2, %s621_s19 }
  0x21   : > { %s259_s24 = sshll.u32 %s258_s16, 4  ;;  %s253_s20 = scalar_lea.vmem [#allocation8], %s605_s18  ;;  %s260_s24 = int_to_ptr.hbm [resolvable:$true] %s259_s24 }
  0x22   : > { %s261_s21 = sshll.u32 %s253_s20, 4  ;;  %p1092_p0 = pnand %p693_p12, %p68_p13  ;;  %s262_s21 = int_to_ptr.vmem [resolvable:$true] %s261_s21 }
  0x23   : > { %s250_s26 = scalar_lea.sflag [#allocation9], %s249_s15  ;;  %s846_s27 = sshra.s32 %s260_s24, 4  ;;  %s847_s27 = int_to_ptr.hbm [resolvable:$true] %s846_s27 }
  0x24   : > { %s848_s28 = scalar_lea.hbm %s847_s27, 8  ;;  %p850_p3 = pneg %p1092_p0 }
  0x25   : > { %p849_p2 = scmp.ne.s32.totalorder %s847_s27, %s848_s28  ;;  %s853_s17 = scalar_lea.hbm %s1157_s2, 16 }
  0x26   : > { %p854_p9 = scmp.lt.s32.totalorder %s847_s27, %s1157_s2  ;;  %p855_p10 = scmp.lt.s32.totalorder %s853_s17, %s848_s28 }
  0x27   : > { %p851_p7 = pnand %p850_p3, %p849_p2 }
  0x28   : > { %p856_p11 = por %p855_p10, %p854_p9 }
  0x29   : > { %p852_p8 = pneg %p851_p7 }
  0x2b   : > { %p857_p12 = pnand %p856_p11, %p852_p8 }
  0x2d   : > { %860 = shalt.err (!%p857_p12)
}
  0x2e   : > { %s964_s15 = smov 64   ;;  %s965_s19 = smov 4  }
  0x2f   : > { %689 = dma.hbm_to_vmem [thread:$0]  (!%p1092_p0), %s260_s24, 128, %s262_s21, %s250_s26, %s964_s15, %s964_s15, %s965_s19  }
  0x30   : > { %273 = sbr.rel (%p1044_p6) target bundleno = 525 (0x20d), region = 44 }
  0x35   : > { %923 = dma.done.wait (%p73_p1), [#allocation6], 384  }
  0x36   : > { %925 = vsyncadd (%p73_p1), [#allocation6], 4294966912  ;;  %s280_s22 = sand.u32 1, %s1031_s0   ;;  %s282_s23 = sand.u32 1, %s948_s29  }
  0x37   : > { %s610_s16 = sshll.u32 %s282_s23, 3  ;;  %s281_s20 = scalar_lea.sflag [#allocation9], %s280_s22 }
  0x38   : > { %s284_s27 = scalar_lea.vmem [#allocation8], %s610_s16 }
  0x39   : > { %927 = dma.done.wait (%p1040_p5), %s281_s20, 128  }
  0x3a   : > { %929 = vsyncadd (%p1040_p5), %s281_s20, 4294967168 }
  0x3b   : > { %931 = dma.done.wait (%p73_p1), [#allocation9], 4096  }
  0x3c   : > { %933 = vsyncadd (%p73_p1), [#allocation9], 4294963200 }
  0x3d   : > { %935 = dma.done.wait (%p73_p1), [#allocation12], 2048  }
  0x3e   : > { %937 = vsyncadd (%p73_p1), [#allocation12], 4294965248  ;;  %322 = sbr.rel (%p601_p4) target bundleno = 73 (0x49), region = 64 }
  0x43   : > { %v323_v0 = vld [vmem:[#allocation5] sm:$0xff]  ;;  %v324_v1 = vld [vmem:[#allocation5 + $0x8] sm:$0xff]  ;;  %v325_v2 = vld [vmem:[#allocation5 + $0x10] sm:$0xff] }
  0x44   : > { %v326_v3 = vmax.f32 %v323_v0, 0.0  ;;  %v327_v4 = vmax.f32 %v324_v1, 0.0  ;;  %v328_v5 = vmax.f32 %v325_v2, 0.0 }
  0x46   : > { %329 = vst [vmem:[#allocation2] sm:$0xff] %v326_v3 }
  0x47   : > { %330 = vst [vmem:[#allocation2 + $0x8] sm:$0xff] %v327_v4 }
  0x48   : > { %331 = vst [vmem:[#allocation2 + $0x10] sm:$0xff] %v328_v5 }
  0x49 PF: > { %v623_v8 = vld [vmem:[%s284_s27] sm:$0xff]   ;;  %vm339_vm0 = vcmask 195584   ;;  %v382_v14 = vld [vmem:[#allocation10 + $0x68] sm:$0xff]  ;;  %v381_v17 = vld [vmem:[#allocation10 + $0x60] sm:$0xff]  ;;  %s447_s9 = sld [smem:[#allocation4 + %s1031_s0]]  ;;  %p616_p1 = scmp.ne.s32.totalorder %s1031_s0, 1 }
  0x4a   : > { %v384_v9 = vld [vmem:[#allocation10 + $0x78] sm:$0xff]  ;;  %v383_v10 = vld [vmem:[#allocation10 + $0x70] sm:$0xff]  ;;  %v624_v12 = vunpack.c.l.bf16 %v623_v8  ;;  %v398_v16 = vld [vmem:[#allocation10 + $0xe8] sm:$0xff]  ;;  %v625_v22 = vunpack.c.h.bf16 %v623_v8 }
  0x4b   : > { %421 = vmatpush.msra.mxu2 %v384_v9  ;;  %v400_v13 = vld [vmem:[#allocation10 + $0xf8] sm:$0xff]  ;;  %v399_v15 = vld [vmem:[#allocation10 + $0xf0] sm:$0xff]  ;;  %v397_v18 = vld [vmem:[#allocation10 + $0xe0] sm:$0xff] }
  0x4c   : > { %401 = vmatpush.msra.mxu1 %v400_v13  ;;  %v380_v19 = vld [vmem:[#allocation10 + $0x58] sm:$0xff]  ;;  %v379_v21 = vld [vmem:[#allocation10 + $0x50] sm:$0xff]  ;;  %v378_v24 = vld [vmem:[#allocation10 + $0x48] sm:$0xff] }
  0x4d   : > { %v336_v11 = vld [vmem:[#allocation2] sm:$0xff]  ;;  %422 = vmatpush.msra.mxu2 %v383_v10  ;;  %v396_v20 = vld [vmem:[#allocation10 + $0xd8] sm:$0xff]  ;;  %v395_v23 = vld [vmem:[#allocation10 + $0xd0] sm:$0xff] }
  0x4e   : > { %v337_v7 = vld [vmem:[#allocation2 + $0x8] sm:$0xff]  ;;  %402 = vmatpush.msra.mxu1 %v399_v15  ;;  %v377_v26 = vld [vmem:[#allocation10 + $0x40] sm:$0xff]  ;;  %v376_v28 = vld [vmem:[#allocation10 + $0x38] sm:$0xff] }
  0x4f   : > { %v338_v6 = vld [vmem:[#allocation2 + $0x10] sm:$0xff]  ;;  %423 = vmatpush.msra.mxu2 %v382_v14  ;;  %v394_v25 = vld [vmem:[#allocation10 + $0xc8] sm:$0xff]  ;;  %v393_v27 = vld [vmem:[#allocation10 + $0xc0] sm:$0xff]  ;;  %s448_s21 = scalar_lea.vmem [#allocation2], %s447_s9 }
  0x50   : > { %359 = vmatpush.msra.mxu0 %v338_v6  ;;  %403 = vmatpush.msra.mxu1 %v398_v16  ;;  %v392_v29 = vld [vmem:[#allocation10 + $0xb8] sm:$0xff]  ;;  %v375_v30 = vld [vmem:[#allocation10 + $0x30] sm:$0xff]  ;;  %v374_v32 = vld [vmem:[#allocation10 + $0x28] sm:$0xff] }
  0x51   : > { %424 = vmatpush.msra.mxu2 %v381_v17  ;;  %v391_v31 = vld [vmem:[#allocation10 + $0xb0] sm:$0xff]  ;;  %v390_v33 = vld [vmem:[#allocation10 + $0xa8] sm:$0xff]  ;;  %v373_v34 = vld [vmem:[#allocation10 + $0x20] sm:$0xff] }
  0x52   : > { %360 = vmatpush.msra.mxu0 %v337_v7  ;;  %404 = vmatpush.msra.mxu1 %v397_v18  ;;  %v372_v35 = vld [vmem:[#allocation10 + $0x18] sm:$0xff]  ;;  %v371_v36 = vld [vmem:[#allocation10 + $0x10] sm:$0xff]  ;;  %v370_v37 = vld [vmem:[#allocation10 + $0x8] sm:$0xff] }
  0x53   : > { %425 = vmatpush.msra.mxu2 %v380_v19  ;;  %v389_v38 = vld [vmem:[#allocation10 + $0xa0] sm:$0xff]  ;;  %v388_v40 = vld [vmem:[#allocation10 + $0x98] sm:$0xff]  ;;  %v387_v41 = vld [vmem:[#allocation10 + $0x90] sm:$0xff] }
  0x54   : > { %361 = vmatpush.msra.mxu0 %v336_v11  ;;  %405 = vmatpush.msra.mxu1 %v396_v20  ;;  %v369_v39 = vld [vmem:[#allocation10] sm:$0xff]  ;;  %v386_v42 = vld [vmem:[#allocation10 + $0x88] sm:$0xff] }
  0x55   : > { %614 = vmatmul.msk.f32.vlgmr.msra.gmra.mxu0 %vm339_vm0, %v624_v12  ;;  %426 = vmatpush.msra.mxu2 %v379_v21  ;;  %v385_v43 = vld [vmem:[#allocation10 + $0x80] sm:$0xff] }
  0x56   : > { %406 = vmatpush.msra.mxu1 %v395_v23  ;;  %v742_v46 = vld [vmem:[%s1159_s4] ss:$0 sm:$0xff] }
  0x57   : > { %427 = vmatpush.msra.mxu2 %v378_v24 }
  0x58   : > { %407 = vmatpush.msra.mxu1 %v394_v25 }
  0x59   : > { %428 = vmatpush.msra.mxu2 %v377_v26 }
  0x5a   : > { %408 = vmatpush.msra.mxu1 %v393_v27 }
  0x5b   : > { %429 = vmatpush.msra.mxu2 %v376_v28 }
  0x5c   : > { %409 = vmatpush.msra.mxu1 %v392_v29 }
  0x5d   : > { %615 = vmatmul.msk.f32.gmra.mxu0 %vm339_vm0, %v625_v22  ;;  %430 = vmatpush.msra.mxu2 %v375_v30 }
  0x5e   : > { %410 = vmatpush.msra.mxu1 %v391_v31 }
  0x5f   : > { %431 = vmatpush.msra.mxu2 %v374_v32 }
  0x60   : > { %411 = vmatpush.msra.mxu1 %v390_v33 }
  0x61   : > { %432 = vmatpush.msra.mxu2 %v373_v34 }
  0x62   : > { %412 = vmatpush.msra.mxu1 %v389_v38 }
  0x63   : > { %433 = vmatpush.msra.mxu2 %v372_v35 }
  0x64   : > { %413 = vmatpush.msra.mxu1 %v388_v40 }
  0x65   : > { %434 = vmatpush.msra.mxu2 %v371_v36 }
  0x66   : > { %414 = vmatpush.msra.mxu1 %v387_v41 }
  0x67   : > { %435 = vmatpush.msra.mxu2 %v370_v37 }
  0x68   : > { %415 = vmatpush.msra.mxu1 %v386_v42 }
  0x69   : > { %436 = vmatpush.msra.mxu2 %v369_v39 }
  0x6a   : > { %416 = vmatpush.msra.mxu1 %v385_v43 }
  0xd2   : > { %v363_v44 = vpop.f32.mrf.mxu0 }
  0xd3   : > { %437 = vmatmul.f32.vlgmr.msra.gmra.mxu2 %v363_v44 }
  0xda   : > { %v366_v45 = vpop.f32.mrf.mxu0 }
  0xdb   : > { %417 = vmatmul.f32.vlgmr.msra.gmra.mxu1 %v366_v45 }
 0x156   : > { %v438_v47 = vpop.f32.mrf.mxu2 }
 0x158   : > { %v418_v48 = vpop.f32.mrf.mxu1 }
 0x159   : > { %v439_v49 = vadd.f32 %v438_v47, %v418_v48 }
 0x15b   : > { %v445_v50 = vadd.f32 %v742_v46, %v439_v49  ;;  %453 = sbr.rel (%p616_p1) target bundleno = 519 (0x207), region = 68 }
 0x15d   : > { %v446_v51 = vmax.f32 %v445_v50, 0.0 }
 0x15f   : > { %449 = vst [vmem:[%s448_s21] sm:$0xff] %v446_v51 }
 0x160   : > { %v472_v52 = vld [vmem:[#allocation11 + $0x78] sm:$0xff]  ;;  %v471_v53 = vld [vmem:[#allocation11 + $0x70] sm:$0xff]  ;;  %v470_v54 = vld [vmem:[#allocation11 + $0x68] sm:$0xff] }
 0x161   : > { %627 = vmatpush.msra.mxu2 %v472_v52  ;;  %477 = vmatpush.msra.mxu0 %v472_v52  ;;  %v469_v55 = vld [vmem:[#allocation11 + $0x60] sm:$0xff]  ;;  %v468_v56 = vld [vmem:[#allocation11 + $0x58] sm:$0xff]  ;;  %v467_v57 = vld [vmem:[#allocation11 + $0x50] sm:$0xff] }
 0x162   : > { %626 = vmatpush.msra.mxu1 %v472_v52  ;;  %v466_v58 = vld [vmem:[#allocation11 + $0x48] sm:$0xff]  ;;  %v465_v59 = vld [vmem:[#allocation11 + $0x40] sm:$0xff]  ;;  %v464_v60 = vld [vmem:[#allocation11 + $0x38] sm:$0xff] }
 0x163   : > { %629 = vmatpush.msra.mxu2 %v471_v53  ;;  %478 = vmatpush.msra.mxu0 %v471_v53  ;;  %v463_v61 = vld [vmem:[#allocation11 + $0x30] sm:$0xff]  ;;  %v462_v62 = vld [vmem:[#allocation11 + $0x28] sm:$0xff]  ;;  %v461_v63 = vld [vmem:[#allocation11 + $0x20] sm:$0xff] }
 0x164   : > { %628 = vmatpush.msra.mxu1 %v471_v53  ;;  %v460_v0 = vld [vmem:[#allocation11 + $0x18] sm:$0xff]  ;;  %v459_v1 = vld [vmem:[#allocation11 + $0x10] sm:$0xff]  ;;  %v458_v2 = vld [vmem:[#allocation11 + $0x8] sm:$0xff] }
 0x165   : > { %631 = vmatpush.msra.mxu2 %v470_v54  ;;  %479 = vmatpush.msra.mxu0 %v470_v54  ;;  %v457_v3 = vld [vmem:[#allocation11] sm:$0xff] }
 0x166   : > { %630 = vmatpush.msra.mxu1 %v470_v54  ;;  %v456_v4 = vld [vmem:[#allocation2 + $0x10] sm:$0xff]  ;;  %v454_v5 = vld [vmem:[#allocation2] sm:$0xff]  ;;  %v455_v6 = vld [vmem:[#allocation2 + $0x8] sm:$0xff] }
 0x167   : > { %633 = vmatpush.msra.mxu2 %v469_v55  ;;  %480 = vmatpush.msra.mxu0 %v469_v55  ;;  %v743_v7 = vld [vmem:[%s1161_s6] ss:$0 sm:$0xff] }
 0x168   : > { %632 = vmatpush.msra.mxu1 %v469_v55 }
 0x169   : > { %635 = vmatpush.msra.mxu2 %v468_v56  ;;  %481 = vmatpush.msra.mxu0 %v468_v56 }
 0x16a   : > { %634 = vmatpush.msra.mxu1 %v468_v56 }
 0x16b   : > { %637 = vmatpush.msra.mxu2 %v467_v57  ;;  %482 = vmatpush.msra.mxu0 %v467_v57 }
 0x16c   : > { %636 = vmatpush.msra.mxu1 %v467_v57 }
 0x16d   : > { %639 = vmatpush.msra.mxu2 %v466_v58  ;;  %483 = vmatpush.msra.mxu0 %v466_v58 }
 0x16e   : > { %638 = vmatpush.msra.mxu1 %v466_v58 }
 0x16f   : > { %641 = vmatpush.msra.mxu2 %v465_v59  ;;  %484 = vmatpush.msra.mxu0 %v465_v59 }
 0x170   : > { %640 = vmatpush.msra.mxu1 %v465_v59 }
 0x171   : > { %643 = vmatpush.msra.mxu2 %v464_v60  ;;  %485 = vmatpush.msra.mxu0 %v464_v60 }
 0x172   : > { %642 = vmatpush.msra.mxu1 %v464_v60 }
 0x173   : > { %645 = vmatpush.msra.mxu2 %v463_v61  ;;  %486 = vmatpush.msra.mxu0 %v463_v61 }
 0x174   : > { %644 = vmatpush.msra.mxu1 %v463_v61 }
 0x175   : > { %647 = vmatpush.msra.mxu2 %v462_v62  ;;  %487 = vmatpush.msra.mxu0 %v462_v62 }
 0x176   : > { %646 = vmatpush.msra.mxu1 %v462_v62 }
 0x177   : > { %649 = vmatpush.msra.mxu2 %v461_v63  ;;  %488 = vmatpush.msra.mxu0 %v461_v63 }
 0x178   : > { %648 = vmatpush.msra.mxu1 %v461_v63 }
 0x179   : > { %651 = vmatpush.msra.mxu2 %v460_v0  ;;  %489 = vmatpush.msra.mxu0 %v460_v0 }
 0x17a   : > { %650 = vmatpush.msra.mxu1 %v460_v0 }
 0x17b   : > { %653 = vmatpush.msra.mxu2 %v459_v1  ;;  %490 = vmatpush.msra.mxu0 %v459_v1 }
 0x17c   : > { %652 = vmatpush.msra.mxu1 %v459_v1 }
 0x17d   : > { %655 = vmatpush.msra.mxu2 %v458_v2  ;;  %491 = vmatpush.msra.mxu0 %v458_v2 }
 0x17e   : > { %654 = vmatpush.msra.mxu1 %v458_v2 }
 0x17f   : > { %657 = vmatpush.msra.mxu2 %v457_v3  ;;  %492 = vmatpush.msra.mxu0 %v457_v3 }
 0x180   : > { %499 = vmatmul.f32.vlgmr.msra.gmra.mxu2 %v456_v4  ;;  %656 = vmatpush.msra.mxu1 %v457_v3 }
 0x181   : > { %493 = vmatmul.f32.vlgmr.msra.gmra.mxu0 %v454_v5  ;;  %496 = vmatmul.f32.vlgmr.msra.gmra.mxu1 %v455_v6 }
 0x1fe   : > { %v494_v8 = vpop.f32.mrf.mxu0  ;;  %v497_v9 = vpop.f32.mrf.mxu1 }
 0x1ff   : > { %v495_v10 = vadd.f32 %v743_v7, %v494_v8  ;;  %v498_v11 = vadd.f32 %v743_v7, %v497_v9 }
 0x201   : > { %503 = vst [vmem:[#allocation13] sm:$0xff] %v495_v10 }
 0x202   : > { %504 = vst [vmem:[#allocation13 + $0x8] sm:$0xff] %v498_v11 }
 0x203   : > { %v500_v12 = vpop.f32.mrf.mxu2 }
 0x204   : > { %v501_v13 = vadd.f32 %v743_v7, %v500_v12 }
 0x206   : > { %505 = vst [vmem:[#allocation13 + $0x10] sm:$0xff] %v501_v13 }
 0x207 PF: > { %p697_p4 = scmp.eq.s32.totalorder %s1031_s0, 1  ;;  %s966_s28 = smov [#allocation13]  }
 0x208   : > { %s511_s12 = sshll.u32 %s966_s28, 4  ;;  %s513_s18 = sshll.u32 %s1162_s7, 4  ;;  %s512_s12 = int_to_ptr.vmem [resolvable:$true] %s511_s12  ;;  %s514_s18 = int_to_ptr.hbm [resolvable:$true] %s513_s18 }
 0x209   : > { %s967_s8 = smov 128   ;;  %s968_s15 = smov 8  }
 0x20a   : > { %673 = dma.vmem_to_hbm [thread:$0]  (%p697_p4), %s512_s12, 384, %s514_s18, [#allocation7], %s967_s8, %s967_s8, %s968_s15  }
 0x20b   : > { %939 = dma.done.wait (%p697_p4), [#allocation7], 384  }
 0x20c   : > { %941 = vsyncadd (%p697_p4), [#allocation7], 4294966912 }
 0x20d PF: > { %p28_p5 = scmp.ge.s32.totalorder %s1070_s11, 4   ;;  %s1167_s28 = smov %s948_s29 }
 0x20e   : > { %s1168_s29 = smov %s952_s30  ;;  %s1169_s30 = smov %s1082_s14 }
 0x20f   : > { %s1170_s8 = smov %s1070_s11  ;;  %30 = sbr.rel (!%p28_p5) target bundleno = 12 (0xc), region = 103 }
 0x214   :  { %530 = vsyncpa [#allocation6], 1 }
 0x215   :  { %532 = vsyncpa [#allocation6 + $0x1], 1 }
 0x216   :  { %533 = vsyncpa [#allocation9], 1 }
 0x217   :  { %535 = vsyncpa [#allocation9 + $0x1], 1 }
 0x218   :  { %536 = vsyncpa [#allocation12], 1 }
 0x219   :  { %537 = vsyncpa [#allocation7], 1 }
 0x21a   :  { %539 = vsyncpa [#allocation7 + $0x1], 1 }

</bundles_post_ra>
